<compile_context>
chip_gen: v6e
topology: v6e:2x2x1
jax: 0.10.0
libtpu: 0.0.40
codegen_flags: <defaults>
</compile_context>

<pallas_src>
import functools

import jax
import jax.numpy as jnp
from jax.experimental import pallas as pl
from jax.experimental.pallas import tpu as pltpu


# ---------------------------------------------------------------------------
# helpers
# ---------------------------------------------------------------------------
def _round_up(x, m):
    return ((x + m - 1) // m) * m


def _vmem_capacity_bytes():
    """Physical VMEM per TensorCore (128 MiB v5e/v6e, 64 MiB v7x)."""
    try:
        cap = int(pltpu.get_tpu_info().vmem_capacity_bytes)
        if cap > 0:
            return cap
    except Exception:
        pass
    return 64 * 1024 * 1024  # conservative default (v7x per-TC)


def _table_block_spec(V, E, index_map, single_buffer):
    if single_buffer:
        # The table's block index never changes; one buffer is enough.  This
        # halves the resident-table VMEM (matters most on v7x's 64 MiB/TC).
        return pl.BlockSpec((V, E), index_map, pipeline_mode=pl.Buffered(1))
    return pl.BlockSpec((V, E), index_map)


# ---------------------------------------------------------------------------
# Path 1: tiny vocab -- table resident in VMEM, gather via one-hot MXU matmul.
# ---------------------------------------------------------------------------
def _onehot_gather_kernel(ids_ref, table_ref, out_ref, *, precision):
    ids = ids_ref[...]                                    # (T, 1) int32
    T = ids.shape[0]
    V = table_ref.shape[0]
    one_hot = (ids == jax.lax.broadcasted_iota(jnp.int32, (T, V), 1))
    one_hot = one_hot.astype(table_ref.dtype)
    # precision=HIGHEST keeps the 0/1 row selection bit-exact for f32 tables
    # (default precision may round rows through bf16 MXU passes).
    out_ref[...] = jnp.dot(
        one_hot, table_ref[...],
        preferred_element_type=jnp.float32,
        precision=precision,
    ).astype(out_ref.dtype)
    # TODO(synk): when E < 128, a lane-dense packed output block
    # ((T*E//128, 128)) would turn the masked vst.msk stores into full-width
    # vsts; skipped here to avoid an in-kernel sublane->lane reshape.


def _lookup_vmem_onehot(flat_ids, table, T, num_tiles, vmem_limit_bytes):
    n_tok = flat_ids.shape[0]
    V, E = table.shape
    dbytes = table.dtype.itemsize
    ids_2d = flat_ids.reshape(n_tok, 1)

    cost = pl.CostEstimate(
        flops=2 * n_tok * V * E,
        transcendentals=0,
        bytes_accessed=n_tok * 4 + V * E * dbytes + n_tok * E * dbytes,
    )

    def build(optimized):
        precision = jax.lax.Precision.HIGHEST if optimized else None
        kernel = functools.partial(_onehot_gather_kernel, precision=precision)
        fn = pl.pallas_call(
            kernel,
            out_shape=jax.ShapeDtypeStruct((n_tok, E), table.dtype),
            grid_spec=pltpu.PrefetchScalarGridSpec(
                num_scalar_prefetch=0,
                grid=(num_tiles,),
                in_specs=[
                    pl.BlockSpec((T, 1), lambda i: (i, 0)),
                    _table_block_spec(V, E, lambda i: (0, 0), optimized),
                ],
                out_specs=pl.BlockSpec((T, E), lambda i: (i, 0)),
            ),
            compiler_params=pltpu.CompilerParams(
                dimension_semantics=("parallel",),
                vmem_limit_bytes=vmem_limit_bytes,
            ),
            cost_estimate=cost,
        )
        return fn(ids_2d, table)

    try:
        return build(True)
    except Exception:
        # Fall back to the conservative config (double-buffered table,
        # default matmul precision) if this jax/Mosaic version rejects
        # pl.Buffered(1) or the precision attribute.
        return build(False)


# ---------------------------------------------------------------------------
# Path 2: medium table -- table resident in VMEM, per-row dynamic gather.
# ---------------------------------------------------------------------------
def _make_vmem_gather_kernel(T):
    def kernel(ids_smem, table_ref, out_ref):
        base = pl.program_id(0) * T

        @pl.loop(0, T)
        def _(j):
            row = ids_smem[base + j]
            out_ref[pl.ds(j, 1), :] = table_ref[pl.ds(row, 1), :]

    return kernel


def _lookup_vmem_gather(flat_ids, table, T, num_tiles, vmem_limit_bytes):
    n_tok = flat_ids.shape[0]
    V, E = table.shape
    dbytes = table.dtype.itemsize

    cost = pl.CostEstimate(
        flops=0,
        transcendentals=0,
        bytes_accessed=n_tok * 4 + V * E * dbytes + n_tok * E * dbytes,
    )

    def build(optimized):
        fn = pl.pallas_call(
            _make_vmem_gather_kernel(T),
            out_shape=jax.ShapeDtypeStruct((n_tok, E), table.dtype),
            grid_spec=pltpu.PrefetchScalarGridSpec(
                num_scalar_prefetch=1,                   # ids -> SMEM
                grid=(num_tiles,),
                in_specs=[
                    _table_block_spec(V, E, lambda i, ids: (0, 0), optimized),
                ],
                out_specs=pl.BlockSpec((T, E), lambda i, ids: (i, 0)),
            ),
            compiler_params=pltpu.CompilerParams(
                dimension_semantics=("parallel",),
                vmem_limit_bytes=vmem_limit_bytes,
            ),
            cost_estimate=cost,
        )
        return fn(flat_ids, table)

    try:
        return build(True)
    except Exception:
        return build(False)


# ---------------------------------------------------------------------------
# Path 3: large table -- HBM-resident, per-row DMA gather straight into the
#          pipelined output block with K row-DMAs in flight.
# ---------------------------------------------------------------------------
def _make_hbm_gather_kernel(T, K):
    def kernel(ids_smem, table_hbm, out_ref, copy_sems):
        base = pl.program_id(0) * T

        def issue(j, row):
            pltpu.make_async_copy(
                table_hbm.at[pl.ds(row, 1)],
                out_ref.at[pl.ds(j, 1)],          # DMA directly into the output block
                copy_sems.at[j % K],
            ).start()

        # Prime the pipeline with K in-flight row copies.
        @pl.loop(0, K)
        def _(j):
            issue(j, ids_smem[base + j])

        # Steady state: read the NEXT id before waiting (keeps the SMEM scalar
        # load off the .wait() barrier), wait row j with a constant-source
        # descriptor (only sem + transfer size matter), refill with row j+K.
        @pl.loop(0, T)
        def _(j):
            row_next = ids_smem[base + jnp.minimum(j + K, T - 1)]
            pltpu.make_async_copy(
                table_hbm.at[pl.ds(0, 1)],
                out_ref.at[pl.ds(j, 1)],
                copy_sems.at[j % K],
            ).wait()

            @pl.when(j + K < T)
            def _():
                issue(j + K, row_next)

    return kernel


def _lookup_hbm_gather(flat_ids, table, T, num_tiles, K):
    n_tok = flat_ids.shape[0]
    V, E = table.shape
    dbytes = table.dtype.itemsize

    cost = pl.CostEstimate(
        flops=0,
        transcendentals=0,
        bytes_accessed=n_tok * 4 + 2 * n_tok * E * dbytes,
    )

    fn = pl.pallas_call(
        _make_hbm_gather_kernel(T, K),
        out_shape=jax.ShapeDtypeStruct((n_tok, E), table.dtype),
        grid_spec=pltpu.PrefetchScalarGridSpec(
            num_scalar_prefetch=1,                       # ids -> SMEM
            grid=(num_tiles,),
            in_specs=[pl.BlockSpec(memory_space=pl.ANY)],   # table stays in HBM
            out_specs=pl.BlockSpec((T, E), lambda i, ids: (i, 0)),
            scratch_shapes=[pltpu.SemaphoreType.DMA((K,))],  # K in-flight DMAs
        ),
        compiler_params=pltpu.CompilerParams(
            dimension_semantics=("parallel",),
        ),
        cost_estimate=cost,
    )
    return fn(flat_ids, table)


# ---------------------------------------------------------------------------
# Public wrapper (== WordEmbedding.forward)
# ---------------------------------------------------------------------------
def word_embedding_lookup(
    ids,
    table,
    *,
    tile_tokens=None,
    prefetch_depth=16,
    onehot_vocab_limit=2048,
    max_tokens_per_call=128 * 1024,
    force_path=None,            # None | "onehot" | "vmem_gather" | "hbm"
):
    """Equivalent of WordEmbedding.forward: table[ids] for any-rank ids."""
    orig_shape = ids.shape
    V, E = table.shape
    dbytes = table.dtype.itemsize

    N = 1
    for d in orig_shape:
        N *= int(d)

    # NOTE: nn.Embedding raises on out-of-range ids; here they are clamped.
    flat_ids = jnp.clip(ids.reshape(N).astype(jnp.int32), 0, V - 1)

    # ---- adaptive token-tile size (multiple of 128) -----------------------
    row_bytes = max(E * dbytes, 1)
    if tile_tokens is None:
        T = (512 * 1024) // row_bytes          # grow T for small E, shrink for big E
    else:
        T = int(tile_tokens)
    T = int(min(1024, max(128, T)))
    T = _round_up(T, 128)
    T = min(T, max(128, _round_up(N, 128)))    # don't overshoot tiny N
    if N > 128:
        # keep >= 2 tiles so "parallel" can feed both TensorCores on v7x
        T = min(T, max(128, _round_up((N + 1) // 2, 128)))

    n_pad = _round_up(N, T)
    if n_pad != N:
        flat_ids = jnp.pad(flat_ids, (0, n_pad - N))   # pad with id 0 (valid row)

    # ---- generation-aware path dispatch -----------------------------------
    vmem_cap = _vmem_capacity_bytes()
    table_bytes = V * E * dbytes
    resident_budget = vmem_cap // 3            # ~42 MiB v5e/v6e, ~21 MiB v7x
    table_fits_vmem = table_bytes <= resident_budget

    if force_path is None:
        if table_fits_vmem and V <= onehot_vocab_limit:
            path = "onehot"
        elif table_fits_vmem:
            path = "vmem_gather"
        else:
            path = "hbm"
    else:
        path = force_path
    if path not in ("onehot", "vmem_gather", "hbm"):
        raise ValueError(f"unknown force_path: {force_path!r}")

    out_block_bytes = T * E * dbytes
    vmem_limit = None
    if path in ("onehot", "vmem_gather"):
        est = table_bytes + 2 * out_block_bytes + (8 << 20)
        if path == "onehot":
            est += 2 * T * V * dbytes          # one-hot tiles / spills
        vmem_limit = int(min(vmem_cap - (2 << 20), max(est, 32 << 20)))

    K = int(max(1, min(prefetch_depth, T)))

    # Chunk very large token counts: SMEM-resident ids pad to next_pow2(4N)
    # bytes, so keep each call's prefetch bounded.
    chunk_tokens = max(T, (int(max_tokens_per_call) // T) * T)

    def run_chunk(chunk_ids):
        nt = chunk_ids.shape[0] // T
        if path == "onehot":
            return _lookup_vmem_onehot(chunk_ids, table, T, nt, vmem_limit)
        if path == "vmem_gather":
            return _lookup_vmem_gather(chunk_ids, table, T, nt, vmem_limit)
        return _lookup_hbm_gather(chunk_ids, table, T, nt, K)

    if n_pad <= chunk_tokens:
        out_flat = run_chunk(flat_ids)
    else:
        pieces = [run_chunk(flat_ids[s:s + chunk_tokens])
                  for s in range(0, n_pad, chunk_tokens)]
        out_flat = jnp.concatenate(pieces, axis=0)

    return out_flat[:N].reshape(*orig_shape, E)


def init_word_embedding_weight(key, vocab_size, embedding_size):
    """Stand-in for nn.Embedding default init: N(0,1), padding row 0 zeroed.

    The 'uniform'/'normal'/'xavier' branches only change the numbers in this
    table, not the forward semantics.
    """
    # TODO(synk): 'pretrained_glove' init reads a pickle file (file I/O); not reproduced here.
    w = jax.random.normal(key, (vocab_size, embedding_size), dtype=jnp.float32)
    w = w.at[0].set(0.0)  # padding_idx=0
    return w


if __name__ == "__main__":
    key = jax.random.PRNGKey(0)
    k_w, k_ids = jax.random.split(key)

    vocab_size = 64        # vocab.vocab_size
    embedding_size = 32    # emb
    B, S = 2, 8            # batch x seq

    table = init_word_embedding_weight(k_w, vocab_size, embedding_size)
    ids = jax.random.randint(k_ids, (B, S), minval=0, maxval=vocab_size,
                             dtype=jnp.int32)

    ref = jnp.take(table, ids, axis=0)

    # Default dispatch (small table -> one-hot MXU path).
    out = jax.block_until_ready(word_embedding_lookup(ids, table))
    assert out.shape == (B, S, embedding_size)
    assert jnp.allclose(out, ref), "default dispatch mismatch"

    # Exercise every path explicitly so all kernels compile and run.
    for path in ("onehot", "vmem_gather", "hbm"):
        out_p = jax.block_until_ready(
            word_embedding_lookup(ids, table, force_path=path))
        assert out_p.shape == (B, S, embedding_size)
        assert jnp.allclose(out_p, ref), f"{path} path mismatch"

    print("KERNEL_OK")
</pallas_src>

<mosaic_0001>
module attributes {stable_mosaic.version = 11 : i64} {
  func.func @_onehot_gather_kernel(%arg0: i32, %arg1: memref<128x1xi32, #tpu.memory_space<vmem>>, %arg2: memref<64x32xf32, #tpu.memory_space<vmem>>, %arg3: memref<128x32xf32, #tpu.memory_space<vmem>>) attributes {dimension_semantics = [#tpu.dimension_semantics<parallel>], iteration_bounds = array<i64: 1>, scalar_prefetch = 0 : i64, scratch_operands = 0 : i64, tpu.core_type = #tpu.core_type<tc>, window_params = [{transform_indices = @transform_0, window_bounds = array<i64: 128, 1>}, {pipeline_mode = #tpu.pipeline_mode<synchronous>, transform_indices = @transform_1, window_bounds = array<i64: 64, 32>}, {transform_indices = @transform_2, window_bounds = array<i64: 128, 32>}]} {
    %c0 = arith.constant 0 : index
    %c0_0 = arith.constant 0 : index
    %0 = vector.load %arg1[%c0, %c0_0] : memref<128x1xi32, #tpu.memory_space<vmem>>, vector<128x1xi32>
    %1 = tpu.iota {dimensions = array<i32: 1>} : vector<128x64xi32>
    %2 = vector.broadcast %0 : vector<128x1xi32> to vector<128x64xi32>
    %3 = arith.cmpi eq, %2, %1 : vector<128x64xi32>
    %4 = arith.extui %3 : vector<128x64xi1> to vector<128x64xi32>
    %5 = arith.sitofp %4 : vector<128x64xi32> to vector<128x64xf32>
    %c0_1 = arith.constant 0 : index
    %c0_2 = arith.constant 0 : index
    %6 = vector.load %arg2[%c0_1, %c0_2] : memref<64x32xf32, #tpu.memory_space<vmem>>, vector<64x32xf32>
    %cst = arith.constant dense<0.000000e+00> : vector<128x32xf32>
    %7 = tpu.matmul %5, %6, %cst {dimension_numbers = #tpu.dot_dimension_numbers<[1], [0], [0], [1], [0, 0, 1, 1], [], []>, precision = #tpu.contract_precision<fp32>} : vector<128x64xf32>, vector<64x32xf32>, vector<128x32xf32> -> vector<128x32xf32>
    %c0_3 = arith.constant 0 : index
    %c0_4 = arith.constant 0 : index
    %8 = vector.load %arg3[%c0_3, %c0_4] : memref<128x32xf32, #tpu.memory_space<vmem>>, vector<128x32xf32>
    tpu.vector_store %arg3[%c0_3, %c0_4], %7 {strides = array<i32>} : memref<128x32xf32, #tpu.memory_space<vmem>>, vector<128x32xf32>,
    return
  }
  func.func @transform_0(%arg0: i32) -> (i32, i32) {
    %c0_i32 = arith.constant 0 : i32
    %c0_i32_0 = arith.constant 0 : i32
    return %arg0, %c0_i32 : i32, i32
  }
  func.func @transform_1(%arg0: i32) -> (i32, i32) {
    %c0_i32 = arith.constant 0 : i32
    %c0_i32_0 = arith.constant 0 : i32
    %c0_i32_1 = arith.constant 0 : i32
    return %c0_i32, %c0_i32_0 : i32, i32
  }
  func.func @transform_2(%arg0: i32) -> (i32, i32) {
    %c0_i32 = arith.constant 0 : i32
    %c0_i32_0 = arith.constant 0 : i32
    return %arg0, %c0_i32 : i32, i32
  }
}

module attributes {stable_mosaic.version = 11 : i64} {
  func.func @_onehot_gather_kernel(%arg0: i32, %arg1: memref<128x1xi32, #tpu.memory_space<vmem>>, %arg2: memref<64x32xf32, #tpu.memory_space<vmem>>, %arg3: memref<128x32xf32, #tpu.memory_space<vmem>>) attributes {dimension_semantics = [#tpu.dimension_semantics<parallel>], iteration_bounds = array<i64: 1>, scalar_prefetch = 0 : i64, scratch_operands = 0 : i64, tpu.core_type = #tpu.core_type<tc>, window_params = [{transform_indices = @transform_0, window_bounds = array<i64: 128, 1>}, {pipeline_mode = #tpu.pipeline_mode<synchronous>, transform_indices = @transform_1, window_bounds = array<i64: 64, 32>}, {transform_indices = @transform_2, window_bounds = array<i64: 128, 32>}]} {
    %c0 = arith.constant 0 : index
    %c0_0 = arith.constant 0 : index
    %0 = vector.load %arg1[%c0, %c0_0] : memref<128x1xi32, #tpu.memory_space<vmem>>, vector<128x1xi32>
    %1 = tpu.iota {dimensions = array<i32: 1>} : vector<128x64xi32>
    %2 = vector.broadcast %0 : vector<128x1xi32> to vector<128x64xi32>
    %3 = arith.cmpi eq, %2, %1 : vector<128x64xi32>
    %4 = arith.extui %3 : vector<128x64xi1> to vector<128x64xi32>
    %5 = arith.sitofp %4 : vector<128x64xi32> to vector<128x64xf32>
    %c0_1 = arith.constant 0 : index
    %c0_2 = arith.constant 0 : index
    %6 = vector.load %arg2[%c0_1, %c0_2] : memref<64x32xf32, #tpu.memory_space<vmem>>, vector<64x32xf32>
    %cst = arith.constant dense<0.000000e+00> : vector<128x32xf32>
    %7 = tpu.matmul %5, %6, %cst {dimension_numbers = #tpu.dot_dimension_numbers<[1], [0], [0], [1], [0, 0, 1, 1], [], []>} : vector<128x64xf32>, vector<64x32xf32>, vector<128x32xf32> -> vector<128x32xf32>
    %c0_3 = arith.constant 0 : index
    %c0_4 = arith.constant 0 : index
    %8 = vector.load %arg3[%c0_3, %c0_4] : memref<128x32xf32, #tpu.memory_space<vmem>>, vector<128x32xf32>
    tpu.vector_store %arg3[%c0_3, %c0_4], %7 {strides = array<i32>} : memref<128x32xf32, #tpu.memory_space<vmem>>, vector<128x32xf32>,
    return
  }
  func.func @transform_0(%arg0: i32) -> (i32, i32) {
    %c0_i32 = arith.constant 0 : i32
    %c0_i32_0 = arith.constant 0 : i32
    return %arg0, %c0_i32 : i32, i32
  }
  func.func @transform_1(%arg0: i32) -> (i32, i32) {
    %c0_i32 = arith.constant 0 : i32
    %c0_i32_0 = arith.constant 0 : i32
    %c0_i32_1 = arith.constant 0 : i32
    return %c0_i32, %c0_i32_0 : i32, i32
  }
  func.func @transform_2(%arg0: i32) -> (i32, i32) {
    %c0_i32 = arith.constant 0 : i32
    %c0_i32_0 = arith.constant 0 : i32
    return %arg0, %c0_i32 : i32, i32
  }
}

</mosaic_0001>

<bundles_post_ra>
// kernel: tpu_custom_call.1
= control target key start
LH: loop header
LB: loop body
LE: loop exit
PB: predicated region body
PF: predicated region fallthrough
CT: control target
= control target key end

     0   :  { %v1837_v0 = vmov 0   ;;  %vm133_vm0 = vcmask 523264   ;;  %s2632_s0 = inlined_call_operand.vmem [shape: s32[128,1], index: 0, kind: input, shape index: {}]   ;;  %s2633_s1 = inlined_call_operand.vmem [shape: f32[64,32], index: 1, kind: input, shape index: {}]   ;;  %s2634_s2 = inlined_call_operand.vmem [shape: f32[128,32], index: 2, kind: output, shape index: {}]  }
   0x1   :  { %1836 = vset.pattern.permute.xlu1 %v1837_v0  ;;  %1835 = vset.pattern.permute.xlu0 %v1837_v0  ;;  %v13_v1 = vld [vmem:[%s2632_s0 + $0x10] sm:$0xff]  ;;  %v11_v2 = vld [vmem:[%s2632_s0] sm:$0xff]  ;;  %v14_v3 = vld [vmem:[%s2632_s0 + $0x18] sm:$0xff] }
   0x2   :  { %36 = vperm.xlu1 %1836, %v13_v1   ;;  %30 = vperm.xlu0 %1835, %v11_v2   ;;  %v12_v4 = vld [vmem:[%s2632_s0 + $0x8] sm:$0xff]  ;;  %v15_v6 = vld [vmem:[%s2632_s0 + $0x20] sm:$0xff]  ;;  %v132_v7 = vld [vmem:[%s2633_s1 + $0x38] sm:$0xff]  ;;  %v27_v1 = vlaneseq }
   0x3   :  { %v16_v5 = vld [vmem:[%s2632_s0 + $0x28] sm:$0xff]  ;;  %v131_v8 = vld [vmem:[%s2633_s1 + $0x30] sm:$0xff]  ;;  %v1878_v9 = vand.u32 4294901760, %v132_v7  ;;  %v129_v12 = vld [vmem:[%s2633_s1 + $0x20] sm:$0xff] }
   0x4   :  { %v1880_v10 = vand.u32 4294901760, %v131_v8  ;;  %v130_v11 = vld [vmem:[%s2633_s1 + $0x28] sm:$0xff]  ;;  %v128_v13 = vld [vmem:[%s2633_s1 + $0x18] sm:$0xff]  ;;  %v1893_v15 = vand.u32 4294901760, %v129_v12  ;;  %v127_v17 = vld [vmem:[%s2633_s1 + $0x10] sm:$0xff]  ;;  %v2024_v2 = vand.u32 127, %v27_v1 }
   0x5   :  { %v1891_v14 = vand.u32 4294901760, %v130_v11  ;;  %v1895_v16 = vand.u32 4294901760, %v128_v13  ;;  %v1901_v18 = vsub.f32 %v132_v7, %v1878_v9  ;;  %1593 = vmatprep.subr.mxu0 %v1878_v9  ;;  %v126_v22 = vld [vmem:[%s2633_s1 + $0x8] sm:$0xff]  ;;  %v18_v23 = vld [vmem:[%s2632_s0 + $0x38] sm:$0xff]  ;;  %v17_v24 = vld [vmem:[%s2632_s0 + $0x30] sm:$0xff]  ;;  %v1929_v27 = vand.u32 4294901760, %v127_v17 }
   0x6   :  { %39 = vperm.xlu1 %1836, %v14_v3   ;;  %33 = vperm.xlu0 %1835, %v12_v4   ;;  %v1904_v19 = vsub.f32 %v131_v8, %v1880_v10  ;;  %v1911_v21 = vsub.f32 %v129_v12, %v1893_v15  ;;  %v125_v30 = vld [vmem:[%s2633_s1] sm:$0xff]  ;;  %v1949_v34 = vand.u32 4294901760, %v126_v22  ;;  %v20_v35 = vld [vmem:[%s2632_s0 + $0x48] sm:$0xff]  ;;  %v22_v45 = vld [vmem:[%s2632_s0 + $0x58] sm:$0xff] }
   0x7   :  { %v1908_v20 = vsub.f32 %v130_v11, %v1891_v14  ;;  %v1923_v25 = vand.u32 4294901760, %v1901_v18  ;;  %1594 = vmatpush3.msra.mxu0 %v1878_v9  ;;  %v1935_v29 = vsub.f32 %v128_v13, %v1895_v16  ;;  %v19_v36 = vld [vmem:[%s2632_s0 + $0x40] sm:$0xff]  ;;  %v1960_v39 = vsub.f32 %v127_v17, %v1929_v27  ;;  %v21_v46 = vld [vmem:[%s2632_s0 + $0x50] sm:$0xff]  ;;  %v24_v53 = vld [vmem:[%s2632_s0 + $0x68] sm:$0xff] }
   0x8   :  { %v1926_v26 = vand.u32 4294901760, %v1904_v19  ;;  %1595 = vmatprep.subr.mxu0 %v1880_v10  ;;  %v1946_v33 = vand.u32 4294901760, %v1911_v21  ;;  %v1963_v40 = vand.u32 4294901760, %v125_v30  ;;  %v1972_v44 = vsub.f32 %v126_v22, %v1949_v34  ;;  %v23_v54 = vld [vmem:[%s2632_s0 + $0x60] sm:$0xff]  ;;  %v26_v59 = vld [vmem:[%s2632_s0 + $0x78] sm:$0xff]  ;;  %v25_v60 = vld [vmem:[%s2632_s0 + $0x70] sm:$0xff] }
   0x9   :  { %v1932_v28 = vand.u32 4294901760, %v1908_v20  ;;  %v435_v31 = vsub.f32 %v1901_v18, %v1923_v25  ;;  %1596 = vmatpush3.msra.mxu0 %v1880_v10  ;;  %v1966_v42 = vand.u32 4294901760, %v1935_v29  ;;  %v1982_v48 = vand.u32 4294901760, %v1960_v39 }
   0xa   :  { %45 = vperm.xlu1 %1836, %v16_v5   ;;  %42 = vperm.xlu0 %1835, %v15_v6   ;;  %v442_v32 = vsub.f32 %v1904_v19, %v1926_v26  ;;  %v456_v43 = vsub.f32 %v1911_v21, %v1946_v33  ;;  %v1985_v49 = vsub.f32 %v125_v30, %v1963_v40  ;;  %v1992_v52 = vand.u32 4294901760, %v1972_v44 }
   0xb   :  { %v436_v37 = vand.u32 4294901760, %v435_v31  ;;  %v449_v38 = vsub.f32 %v1908_v20, %v1932_v28  ;;  %1597 = vmatprep.subr.mxu0 %v1891_v14  ;;  %v463_v50 = vsub.f32 %v1935_v29, %v1966_v42  ;;  %v470_v55 = vsub.f32 %v1960_v39, %v1982_v48 }
   0xc   :  { %v443_v41 = vand.u32 4294901760, %v442_v32  ;;  %1598 = vmatpush3.msra.mxu0 %v1891_v14  ;;  %v457_v51 = vand.u32 4294901760, %v456_v43  ;;  %v2004_v56 = vand.u32 4294901760, %v1985_v49  ;;  %v477_v58 = vsub.f32 %v1972_v44, %v1992_v52 }
   0xd   :  { %1633 = vmatprep.subr.mxu1 %v436_v37  ;;  %1599 = vmatprep.subr.mxu0 %v1893_v15  ;;  %v450_v47 = vand.u32 4294901760, %v449_v38  ;;  %v464_v57 = vand.u32 4294901760, %v463_v50  ;;  %v471_v61 = vand.u32 4294901760, %v470_v55  ;;  %v1838_v5 = vmov 0.0  }
   0xe   :  { %51 = vperm.xlu1 %1836, %v18_v23   ;;  %48 = vperm.xlu0 %1835, %v17_v24   ;;  %v484_v62 = vsub.f32 %v1985_v49, %v2004_v56  ;;  %v478_v63 = vand.u32 4294901760, %v477_v58 }
   0xf   :  { %1634 = vmatpush3.msra.mxu1 %v436_v37  ;;  %1600 = vmatpush3.msra.mxu0 %v1893_v15 }
  0x10   :  { %1635 = vmatprep.subr.mxu1 %v443_v41  ;;  %1601 = vmatprep.subr.mxu0 %v1895_v16  ;;  %v485_v0 = vand.u32 4294901760, %v484_v62 }
  0x11   :  { %1636 = vmatpush3.msra.mxu1 %v443_v41  ;;  %1602 = vmatpush3.msra.mxu0 %v1895_v16 }
  0x12   :  { %57 = vperm.xlu1 %1836, %v20_v35   ;;  %54 = vperm.xlu0 %1835, %v19_v36  }
  0x13   :  { %1637 = vmatprep.subr.mxu1 %v450_v47  ;;  %1603 = vmatprep.subr.mxu0 %v1929_v27 }
  0x14   :  { %1638 = vmatpush3.msra.mxu1 %v450_v47  ;;  %1604 = vmatpush3.msra.mxu0 %v1929_v27 }
  0x15   :  { %1639 = vmatprep.subr.mxu1 %v457_v51  ;;  %1605 = vmatprep.subr.mxu0 %v1949_v34 }
  0x16   :  { %63 = vperm.xlu1 %1836, %v22_v45   ;;  %60 = vperm.xlu0 %1835, %v21_v46  }
  0x17   :  { %1640 = vmatpush3.msra.mxu1 %v457_v51  ;;  %1606 = vmatpush3.msra.mxu0 %v1949_v34 }
  0x18   :  { %1641 = vmatprep.subr.mxu1 %v464_v57  ;;  %1607 = vmatprep.subr.mxu0 %v1963_v40 }
  0x19   :  { %1642 = vmatpush3.msra.mxu1 %v464_v57  ;;  %1608 = vmatpush3.msra.mxu0 %v1963_v40 }
  0x1a   :  { %69 = vperm.xlu1 %1836, %v24_v53   ;;  %66 = vperm.xlu0 %1835, %v23_v54  }
  0x1b   :  { %1643 = vmatprep.subr.mxu1 %v471_v61  ;;  %1673 = vmatprep.subr.mxu0 %v1901_v18 }
  0x1c   :  { %1644 = vmatpush3.msra.mxu1 %v471_v61 }
  0x1d   :  { %1645 = vmatprep.subr.mxu1 %v478_v63 }
  0x1e   :  { %75 = vperm.xlu1 %1836, %v26_v59   ;;  %72 = vperm.xlu0 %1835, %v25_v60  }
  0x1f   :  { %1646 = vmatpush3.msra.mxu1 %v478_v63 }
  0x20   :  { %1647 = vmatprep.subr.mxu1 %v485_v0 }
  0x21   :  { %1648 = vmatpush3.msra.mxu1 %v485_v0 }
  0x22   :  { %1713 = vmatprep.subr.mxu1 %v1878_v9 }
  0x7d   :  { %v37_v3 = vpop.permute.xlu1 %36  ;;  %v31_v4 = vpop.permute.xlu0 %30 }
  0x7e   :  { %vm79_vm1 = vcmp.eq.s32.totalorder %v37_v3, %v2024_v2  ;;  %vm77_vm2 = vcmp.eq.s32.totalorder %v31_v4, %v2024_v2 }
  0x7f   :  { %v2029_v6 = vsel %vm79_vm1, 1.0, %v1838_v5  ;;  %v2032_v7 = vsel %vm77_vm2, 1.0, %v1838_v5 }
  0x80   :  { %v141_v8 = vsel %vm133_vm0, %v2029_v6, 0  ;;  %1649 = vmatprep.mubr.msk.f32.mxu1 %vm133_vm0, %v2032_v7  ;;  %v135_v11 = vsel %vm133_vm0, %v2032_v7, 0 }
  0x81   :  { %v2040_v12 = vsub.f32 %v141_v8, %v141_v8  ;;  %v40_v13 = vpop.permute.xlu1 %39  ;;  %v34_v17 = vpop.permute.xlu0 %33  ;;  %v2042_v22 = vsub.f32 %v135_v11, %v135_v11 }
  0x82   :  { %vm80_vm3 = vcmp.eq.s32.totalorder %v40_v13, %v2024_v2  ;;  %vm78_vm4 = vcmp.eq.s32.totalorder %v34_v17, %v2024_v2 }
  0x83   :  { %v2047_v23 = vsel %vm80_vm3, 1.0, %v1838_v5  ;;  %v2050_v24 = vsel %vm78_vm4, 1.0, %v1838_v5  ;;  %v257_v30 = vand.u32 4294901760, %v2042_v22  ;;  %v277_v35 = vand.u32 4294901760, %v2040_v12 }
  0x84   :  { %v144_v31 = vsel %vm133_vm0, %v2047_v23, 0  ;;  %v138_v32 = vsel %vm133_vm0, %v2050_v24, 0  ;;  %1650 = vmatmul.mubr.msk.f32.vlgmr.msra.gmra.mxu1 %vm133_vm0, %v2050_v24 }
  0x85   :  { %v2060_v36 = vsub.f32 %v144_v31, %v144_v31  ;;  %v2062_v37 = vsub.f32 %v138_v32, %v138_v32  ;;  %v46_v38 = vpop.permute.xlu1 %45  ;;  %1652 = vmatprep.mubr.msk.f32.mxu1 %vm133_vm0, %v2029_v6  ;;  %v43_v41 = vpop.permute.xlu0 %42  ;;  %v258_v43 = vsub.f32 %v2042_v22, %v257_v30  ;;  %1714 = vmatpush3.msra.mxu1 %v1878_v9 }
  0x86   :  { %vm82_vm5 = vcmp.eq.s32.totalorder %v46_v38, %v2024_v2  ;;  %vm81_vm6 = vcmp.eq.s32.totalorder %v43_v41, %v2024_v2  ;;  %1715 = vmatprep.subr.mxu1 %v1880_v10  ;;  %v278_v54 = vsub.f32 %v2040_v12, %v277_v35 }
  0x87   :  { %v2073_v45 = vsel %vm82_vm5, 1.0, %v1838_v5  ;;  %v2076_v46 = vsel %vm81_vm6, 1.0, %v1838_v5  ;;  %v259_v47 = vand.u32 4294901760, %v258_v43  ;;  %v267_v50 = vand.u32 4294901760, %v2062_v37  ;;  %1716 = vmatpush3.msra.mxu1 %v1880_v10 }
  0x88   :  { %v150_v51 = vsel %vm133_vm0, %v2073_v45, 0  ;;  %v147_v53 = vsel %vm133_vm0, %v2076_v46, 0  ;;  %1653 = vmatmul.mubr.msk.f32.gmra.mxu1 %vm133_vm0, %v2047_v23  ;;  %v2641_v55 = vand.u32 4294901760, %v2060_v36  ;;  %1717 = vmatprep.subr.mxu1 %v1891_v14  ;;  %v279_v11 = vand.u32 4294901760, %v278_v54 }
  0x89   :  { %v2090_v57 = vsub.f32 %v150_v51, %v150_v51  ;;  %v2092_v58 = vsub.f32 %v147_v53, %v147_v53  ;;  %v52_v59 = vpop.permute.xlu1 %51  ;;  %1609 = vmatprep.mubr.f32.mxu0 %v259_v47  ;;  %1655 = vmatprep.mubr.msk.f32.mxu1 %vm133_vm0, %v2076_v46  ;;  %v49_v60 = vpop.permute.xlu0 %48  ;;  %v268_v61 = vsub.f32 %v2062_v37, %v267_v50 }
  0x8a   :  { %vm84_vm7 = vcmp.eq.s32.totalorder %v52_v59, %v2024_v2  ;;  %vm83_vm8 = vcmp.eq.s32.totalorder %v49_v60, %v2024_v2  ;;  %v288_v62 = vsub.f32 %v2060_v36, %v2641_v55  ;;  %1718 = vmatpush3.msra.mxu1 %v1891_v14 }
  0x8b   :  { %v2106_v63 = vsel %vm84_vm7, 1.0, %v1838_v5  ;;  %v2109_v0 = vsel %vm83_vm8, 1.0, %v1838_v5  ;;  %v269_v1 = vand.u32 4294901760, %v268_v61  ;;  %v2640_v3 = vand.u32 4294901760, %v2092_v58  ;;  %1719 = vmatprep.subr.mxu1 %v1893_v15 }
  0x8c   :  { %v156_v4 = vsel %vm133_vm0, %v2106_v63, 0  ;;  %v153_v8 = vsel %vm133_vm0, %v2109_v0, 0  ;;  %1656 = vmatmul.mubr.msk.f32.gmra.mxu1 %vm133_vm0, %v2073_v45  ;;  %v2637_v13 = vand.u32 4294901760, %v2090_v57  ;;  %v289_v43 = vand.u32 4294901760, %v288_v62 }
  0x8d   :  { %v2120_v17 = vsub.f32 %v156_v4, %v156_v4  ;;  %v2122_v31 = vsub.f32 %v153_v8, %v153_v8  ;;  %v58_v32 = vpop.permute.xlu1 %57  ;;  %1610 = vmatmul.mubr.f32.vlgmr.msra.gmra.mxu0 %v269_v1  ;;  %1658 = vmatprep.mubr.msk.f32.mxu1 %vm133_vm0, %v2109_v0  ;;  %v55_v38 = vpop.permute.xlu0 %54  ;;  %v298_v41 = vsub.f32 %v2092_v58, %v2640_v3 }
  0x8e   :  { %vm86_vm9 = vcmp.eq.s32.totalorder %v58_v32, %v2024_v2  ;;  %1674 = vmatpush3.msra.mxu0 %v1901_v18  ;;  %vm85_vm10 = vcmp.eq.s32.totalorder %v55_v38, %v2024_v2  ;;  %1612 = vmatprep.mubr.f32.mxu0 %v279_v11  ;;  %v308_v47 = vsub.f32 %v2090_v57, %v2637_v13 }
  0x8f   :  { %v2136_v51 = vsel %vm86_vm9, 1.0, %v1838_v5  ;;  %v2139_v53 = vsel %vm85_vm10, 1.0, %v1838_v5  ;;  %1675 = vmatprep.subr.mxu0 %v1904_v19  ;;  %v299_v54 = vand.u32 4294901760, %v298_v41  ;;  %v2636_v59 = vand.u32 4294901760, %v2122_v31  ;;  %1720 = vmatpush3.msra.mxu1 %v1893_v15 }
  0x90   :  { %v162_v18 = vsel %vm133_vm0, %v2136_v51, 0  ;;  %v159_v60 = vsel %vm133_vm0, %v2139_v53, 0  ;;  %1659 = vmatmul.mubr.msk.f32.gmra.mxu1 %vm133_vm0, %v2106_v63  ;;  %1676 = vmatpush3.msra.mxu0 %v1904_v19  ;;  %v2635_v61 = vand.u32 4294901760, %v2120_v17  ;;  %v309_v19 = vand.u32 4294901760, %v308_v47 }
  0x91   :  { %v2152_v62 = vsub.f32 %v162_v18, %v162_v18  ;;  %v2154_v1 = vsub.f32 %v159_v60, %v159_v60  ;;  %v64_v4 = vpop.permute.xlu1 %63  ;;  %1613 = vmatmul.mubr.f32.gmra.mxu0 %v289_v43  ;;  %1661 = vmatprep.mubr.msk.f32.mxu1 %vm133_vm0, %v2139_v53  ;;  %v61_v8 = vpop.permute.xlu0 %60  ;;  %v318_v11 = vsub.f32 %v2122_v31, %v2636_v59 }
  0x92   :  { %vm88_vm11 = vcmp.eq.s32.totalorder %v64_v4, %v2024_v2  ;;  %vm87_vm12 = vcmp.eq.s32.totalorder %v61_v8, %v2024_v2  ;;  %1615 = vmatprep.mubr.f32.mxu0 %v299_v54  ;;  %1677 = vmatprep.subr.mxu0 %v1908_v20  ;;  %v328_v32 = vsub.f32 %v2120_v17, %v2635_v61 }
  0x93   :  { %v2168_v38 = vsel %vm88_vm11, 1.0, %v1838_v5  ;;  %v2171_v41 = vsel %vm87_vm12, 1.0, %v1838_v5  ;;  %1678 = vmatpush3.msra.mxu0 %v1908_v20  ;;  %v319_v43 = vand.u32 4294901760, %v318_v11  ;;  %v2639_v18 = vand.u32 4294901760, %v2154_v1  ;;  %1721 = vmatprep.subr.mxu1 %v1895_v16 }
  0x94   :  { %v168_v47 = vsel %vm133_vm0, %v2168_v38, 0  ;;  %v165_v54 = vsel %vm133_vm0, %v2171_v41, 0  ;;  %1662 = vmatmul.mubr.msk.f32.gmra.mxu1 %vm133_vm0, %v2136_v51  ;;  %1679 = vmatprep.subr.mxu0 %v1911_v21  ;;  %v2638_v60 = vand.u32 4294901760, %v2152_v62  ;;  %v329_v59 = vand.u32 4294901760, %v328_v32 }
  0x95   :  { %v2184_v4 = vsub.f32 %v168_v47, %v168_v47  ;;  %v2186_v20 = vsub.f32 %v165_v54, %v165_v54  ;;  %v70_v8 = vpop.permute.xlu1 %69  ;;  %1616 = vmatmul.mubr.f32.gmra.mxu0 %v309_v19  ;;  %1664 = vmatprep.mubr.msk.f32.mxu1 %vm133_vm0, %v2171_v41  ;;  %v67_v11 = vpop.permute.xlu0 %66  ;;  %v338_v61 = vsub.f32 %v2154_v1, %v2639_v18 }
  0x96   :  { %vm90_vm13 = vcmp.eq.s32.totalorder %v70_v8, %v2024_v2  ;;  %vm89_vm14 = vcmp.eq.s32.totalorder %v67_v11, %v2024_v2  ;;  %1618 = vmatprep.mubr.f32.mxu0 %v319_v43  ;;  %1680 = vmatpush3.msra.mxu0 %v1911_v21  ;;  %v348_v19 = vsub.f32 %v2152_v62, %v2638_v60 }
  0x97   :  { %v2200_v47 = vsel %vm90_vm13, 1.0, %v1838_v5  ;;  %v2203_v54 = vsel %vm89_vm14, 1.0, %v1838_v5  ;;  %v339_v13 = vand.u32 4294901760, %v338_v61  ;;  %1681 = vmatprep.subr.mxu0 %v1935_v29  ;;  %v2642_v43 = vand.u32 4294901760, %v2186_v20  ;;  %1722 = vmatpush3.msra.mxu1 %v1895_v16 }
  0x98   :  { %v174_v21 = vsel %vm133_vm0, %v2200_v47, 0  ;;  %v171_v32 = vsel %vm133_vm0, %v2203_v54, 0  ;;  %1665 = vmatmul.mubr.msk.f32.gmra.mxu1 %vm133_vm0, %v2168_v38  ;;  %v2643_v8 = vand.u32 4294901760, %v2184_v4  ;;  %v349_v55 = vand.u32 4294901760, %v348_v19  ;;  %1682 = vmatpush3.msra.mxu0 %v1935_v29 }
  0x99   :  { %v2216_v61 = vsub.f32 %v174_v21, %v174_v21  ;;  %v2218_v11 = vsub.f32 %v171_v32, %v171_v32  ;;  %v76_v60 = vpop.permute.xlu1 %75  ;;  %1619 = vmatmul.mubr.f32.gmra.mxu0 %v329_v59  ;;  %1667 = vmatprep.mubr.msk.f32.mxu1 %vm133_vm0, %v2203_v54  ;;  %v73_v18 = vpop.permute.xlu0 %72  ;;  %v358_v3 = vsub.f32 %v2186_v20, %v2642_v43 }
  0x9a   :  { %vm92_vm15 = vcmp.eq.s32.totalorder %v76_v60, %v2024_v2  ;;  %vm91_vm1 = vcmp.eq.s32.totalorder %v73_v18, %v2024_v2  ;;  %1621 = vmatprep.mubr.f32.mxu0 %v339_v13  ;;  %v368_v59 = vsub.f32 %v2184_v4, %v2643_v8  ;;  %1683 = vmatprep.subr.mxu0 %v1960_v39 }
  0x9b   :  { %v2232_v21 = vsel %vm92_vm15, 1.0, %v1838_v5  ;;  %v2235_v32 = vsel %vm91_vm1, 1.0, %v1838_v5  ;;  %v359_v43 = vand.u32 4294901760, %v358_v3  ;;  %v377_v2 = vand.u32 4294901760, %v2218_v11  ;;  %1723 = vmatprep.subr.mxu1 %v1929_v27  ;;  %1684 = vmatpush3.msra.mxu0 %v1960_v39 }
  0x9c   :  { %v180_v29 = vsel %vm133_vm0, %v2232_v21, 0  ;;  %v177_v13 = vsel %vm133_vm0, %v2235_v32, 0  ;;  %1668 = vmatmul.mubr.msk.f32.gmra.mxu1 %vm133_vm0, %v2200_v47  ;;  %v387_v5 = vand.u32 4294901760, %v2216_v61  ;;  %v369_v19 = vand.u32 4294901760, %v368_v59  ;;  %1685 = vmatprep.subr.mxu0 %v1972_v44 }
  0x9d   :  { %v2248_v18 = vsub.f32 %v180_v29, %v180_v29  ;;  %v2250_v3 = vsub.f32 %v177_v13, %v177_v13  ;;  %1622 = vmatmul.mubr.f32.gmra.mxu0 %v349_v55  ;;  %1670 = vmatprep.mubr.msk.f32.mxu1 %vm133_vm0, %v2235_v32  ;;  %v378_v60 = vsub.f32 %v2218_v11, %v377_v2 }
  0x9e   :  { %1624 = vmatprep.mubr.f32.mxu0 %v359_v43  ;;  %1724 = vmatpush3.msra.mxu1 %v1929_v27  ;;  %v388_v55 = vsub.f32 %v2216_v61, %v387_v5 }
  0x9f   :  { %1725 = vmatprep.subr.mxu1 %v1949_v34  ;;  %v379_v29 = vand.u32 4294901760, %v378_v60  ;;  %v397_v13 = vand.u32 4294901760, %v2250_v3  ;;  %v407_v8 = vand.u32 4294901760, %v2248_v18  ;;  %1686 = vmatpush3.msra.mxu0 %v1972_v44  ;;  %v2644_v44 = vand.u32 4294901760, %v2060_v36 }
  0xa0   :  { %1671 = vmatmul.mubr.msk.f32.gmra.mxu1 %vm133_vm0, %v2232_v21  ;;  %v389_v43 = vand.u32 4294901760, %v388_v55  ;;  %1687 = vmatprep.subr.mxu0 %v1985_v49 }
  0xa1   :  { %1625 = vmatmul.mubr.f32.gmra.mxu0 %v369_v19  ;;  %1726 = vmatpush3.msra.mxu1 %v1949_v34  ;;  %v398_v39 = vsub.f32 %v2250_v3, %v397_v13  ;;  %v408_v60 = vsub.f32 %v2248_v18, %v407_v8 }
  0xa2   :  { %1729 = vmatprep.mubr.f32.mxu1 %v257_v30  ;;  %1627 = vmatprep.mubr.f32.mxu0 %v379_v29 }
  0xa3   :  { %1727 = vmatprep.subr.mxu1 %v1963_v40  ;;  %v399_v59 = vand.u32 4294901760, %v398_v39  ;;  %v409_v30 = vand.u32 4294901760, %v408_v60  ;;  %1688 = vmatpush3.msra.mxu0 %v1985_v49  ;;  %v2646_v49 = vand.u32 4294901760, %v2090_v57 }
  0xa4   :  { %1728 = vmatpush3.msra.mxu1 %v1963_v40  ;;  %1753 = vmatprep.subr.mxu0 %v1923_v25 }
  0xa5   :  { %1730 = vmatmul.mubr.f32.vlgmr.msra.gmra.mxu1 %v267_v50  ;;  %1628 = vmatmul.mubr.f32.gmra.mxu0 %v389_v43  ;;  %v2645_v50 = vand.u32 4294901760, %v2092_v58 }
  0xa6   :  { %1732 = vmatprep.mubr.f32.mxu1 %v277_v35  ;;  %1630 = vmatprep.mubr.f32.mxu0 %v399_v59 }
  0xa7   :  { %1793 = vmatprep.subr.mxu1 %v1878_v9 }
  0xa8   :  { %1794 = vmatpush3.msra.mxu1 %v1878_v9  ;;  %v2647_v9 = vand.u32 4294901760, %v2122_v31 }
  0xa9   :  { %1733 = vmatmul.mubr.f32.gmra.mxu1 %v2644_v44  ;;  %1631 = vmatmul.mubr.f32.gmra.mxu0 %v409_v30 }
  0xaa   :  { %1735 = vmatprep.mubr.f32.mxu1 %v2645_v50  ;;  %1689 = vmatprep.mubr.f32.mxu0 %v2042_v22  ;;  %v2649_v22 = vand.u32 4294901760, %v2154_v1 }
  0xab   :  { %1795 = vmatprep.subr.mxu1 %v1880_v10 }
  0xac   :  { %1796 = vmatpush3.msra.mxu1 %v1880_v10  ;;  %v2648_v10 = vand.u32 4294901760, %v2120_v17 }
  0xad   :  { %1736 = vmatmul.mubr.f32.gmra.mxu1 %v2646_v49  ;;  %1690 = vmatmul.mubr.f32.vlgmr.msra.gmra.mxu0 %v2062_v37 }
  0xae   :  { %1738 = vmatprep.mubr.f32.mxu1 %v2647_v9  ;;  %1754 = vmatpush3.msra.mxu0 %v1923_v25  ;;  %v2650_v25 = vand.u32 4294901760, %v2152_v62 }
  0xaf   :  { %1692 = vmatprep.mubr.f32.mxu0 %v2040_v12  ;;  %1755 = vmatprep.subr.mxu0 %v1926_v26 }
  0xb0   :  { %1756 = vmatpush3.msra.mxu0 %v1926_v26  ;;  %1797 = vmatprep.subr.mxu1 %v1891_v14  ;;  %v2651_v26 = vand.u32 4294901760, %v2186_v20 }
  0xb1   :  { %1739 = vmatmul.mubr.f32.gmra.mxu1 %v2648_v10  ;;  %1693 = vmatmul.mubr.f32.gmra.mxu0 %v2060_v36 }
  0xb2   :  { %1741 = vmatprep.mubr.f32.mxu1 %v2649_v22  ;;  %1695 = vmatprep.mubr.f32.mxu0 %v2092_v58 }
  0xb3   :  { %1757 = vmatprep.subr.mxu0 %v1932_v28  ;;  %1798 = vmatpush3.msra.mxu1 %v1891_v14  ;;  %v2652_v14 = vand.u32 4294901760, %v2184_v4 }
  0xb4   :  { %1758 = vmatpush3.msra.mxu0 %v1932_v28  ;;  %1799 = vmatprep.subr.mxu1 %v1893_v15 }
  0xb5   :  { %1742 = vmatmul.mubr.f32.gmra.mxu1 %v2650_v25  ;;  %1696 = vmatmul.mubr.f32.gmra.mxu0 %v2090_v57 }
  0xb6   :  { %1744 = vmatprep.mubr.f32.mxu1 %v2651_v26  ;;  %1698 = vmatprep.mubr.f32.mxu0 %v2122_v31 }
  0xb7   :  { %1759 = vmatprep.subr.mxu0 %v1946_v33  ;;  %1800 = vmatpush3.msra.mxu1 %v1893_v15 }
  0xb8   :  { %1760 = vmatpush3.msra.mxu0 %v1946_v33  ;;  %1801 = vmatprep.subr.mxu1 %v1895_v16 }
  0xb9   :  { %1745 = vmatmul.mubr.f32.gmra.mxu1 %v2652_v14  ;;  %1699 = vmatmul.mubr.f32.gmra.mxu0 %v2120_v17 }
  0xba   :  { %1747 = vmatprep.mubr.f32.mxu1 %v377_v2  ;;  %1701 = vmatprep.mubr.f32.mxu0 %v2154_v1 }
  0xbb   :  { %1761 = vmatprep.subr.mxu0 %v1966_v42  ;;  %1802 = vmatpush3.msra.mxu1 %v1895_v16 }
  0xbc   :  { %1762 = vmatpush3.msra.mxu0 %v1966_v42  ;;  %1803 = vmatprep.subr.mxu1 %v1929_v27 }
  0xbd   :  { %1748 = vmatmul.mubr.f32.gmra.mxu1 %v387_v5  ;;  %1702 = vmatmul.mubr.f32.gmra.mxu0 %v2152_v62 }
  0xbe   :  { %1750 = vmatprep.mubr.f32.mxu1 %v397_v13  ;;  %1704 = vmatprep.mubr.f32.mxu0 %v2186_v20 }
  0xbf   :  { %1804 = vmatpush3.msra.mxu1 %v1929_v27  ;;  %1763 = vmatprep.subr.mxu0 %v1982_v48 }
  0xc0   :  { %1805 = vmatprep.subr.mxu1 %v1949_v34  ;;  %1764 = vmatpush3.msra.mxu0 %v1982_v48 }
  0xc1   :  { %1751 = vmatmul.mubr.f32.gmra.mxu1 %v407_v8  ;;  %1705 = vmatmul.mubr.f32.gmra.mxu0 %v2184_v4 }
  0xc2   :  { %1806 = vmatpush3.msra.mxu1 %v1949_v34  ;;  %1809 = vmatprep.mubr.msk.f32.mxu1 %vm133_vm0, %v2032_v7 }
  0xc3   :  { %1707 = vmatprep.mubr.f32.mxu0 %v2218_v11  ;;  %1807 = vmatprep.subr.mxu1 %v1963_v40 }
  0xc4   :  { %1808 = vmatpush3.msra.mxu1 %v1963_v40  ;;  %1765 = vmatprep.subr.mxu0 %v1992_v52 }
  0xc5   :  { %1810 = vmatmul.mubr.msk.f32.vlgmr.msra.gmra.mxu1 %vm133_vm0, %v2050_v24  ;;  %1708 = vmatmul.mubr.f32.gmra.mxu0 %v2216_v61 }
  0xc6   :  { %1766 = vmatpush3.msra.mxu0 %v1992_v52  ;;  %1812 = vmatprep.mubr.msk.f32.mxu1 %vm133_vm0, %v2029_v6 }
  0xc7   :  { %1710 = vmatprep.mubr.f32.mxu0 %v2250_v3  ;;  %1767 = vmatprep.subr.mxu0 %v2004_v56 }
  0xc8   :  { %1768 = vmatpush3.msra.mxu0 %v2004_v56 }
  0xc9   :  { %1813 = vmatmul.mubr.msk.f32.gmra.mxu1 %vm133_vm0, %v2047_v23  ;;  %1711 = vmatmul.mubr.f32.gmra.mxu0 %v2248_v18 }
  0xca   :  { %1815 = vmatprep.mubr.msk.f32.mxu1 %vm133_vm0, %v2076_v46  ;;  %1769 = vmatprep.mubr.msk.f32.mxu0 %vm133_vm0, %v2032_v7 }
  0xcd   :  { %1816 = vmatmul.mubr.msk.f32.gmra.mxu1 %vm133_vm0, %v2073_v45  ;;  %1770 = vmatmul.mubr.msk.f32.vlgmr.msra.gmra.mxu0 %vm133_vm0, %v2050_v24 }
  0xce   :  { %1818 = vmatprep.mubr.msk.f32.mxu1 %vm133_vm0, %v2109_v0  ;;  %1772 = vmatprep.mubr.msk.f32.mxu0 %vm133_vm0, %v2029_v6 }
  0xd1   :  { %1819 = vmatmul.mubr.msk.f32.gmra.mxu1 %vm133_vm0, %v2106_v63  ;;  %1773 = vmatmul.mubr.msk.f32.gmra.mxu0 %vm133_vm0, %v2047_v23 }
  0xd2   :  { %1821 = vmatprep.mubr.msk.f32.mxu1 %vm133_vm0, %v2139_v53  ;;  %1775 = vmatprep.mubr.msk.f32.mxu0 %vm133_vm0, %v2076_v46 }
  0xd5   :  { %1822 = vmatmul.mubr.msk.f32.gmra.mxu1 %vm133_vm0, %v2136_v51  ;;  %1776 = vmatmul.mubr.msk.f32.gmra.mxu0 %vm133_vm0, %v2073_v45 }
  0xd6   :  { %1824 = vmatprep.mubr.msk.f32.mxu1 %vm133_vm0, %v2171_v41  ;;  %1778 = vmatprep.mubr.msk.f32.mxu0 %vm133_vm0, %v2109_v0 }
  0xd9   :  { %1825 = vmatmul.mubr.msk.f32.gmra.mxu1 %vm133_vm0, %v2168_v38  ;;  %1779 = vmatmul.mubr.msk.f32.gmra.mxu0 %vm133_vm0, %v2106_v63 }
  0xda   :  { %1827 = vmatprep.mubr.msk.f32.mxu1 %vm133_vm0, %v2203_v54  ;;  %1781 = vmatprep.mubr.msk.f32.mxu0 %vm133_vm0, %v2139_v53 }
  0xdd   :  { %1828 = vmatmul.mubr.msk.f32.gmra.mxu1 %vm133_vm0, %v2200_v47  ;;  %1782 = vmatmul.mubr.msk.f32.gmra.mxu0 %vm133_vm0, %v2136_v51 }
  0xde   :  { %1830 = vmatprep.mubr.msk.f32.mxu1 %vm133_vm0, %v2235_v32  ;;  %1784 = vmatprep.mubr.msk.f32.mxu0 %vm133_vm0, %v2171_v41 }
  0xe1   :  { %1831 = vmatmul.mubr.msk.f32.gmra.mxu1 %vm133_vm0, %v2232_v21  ;;  %1785 = vmatmul.mubr.msk.f32.gmra.mxu0 %vm133_vm0, %v2168_v38 }
  0xe2   :  { %1787 = vmatprep.mubr.msk.f32.mxu0 %vm133_vm0, %v2203_v54 }
  0xe5   :  { %1788 = vmatmul.mubr.msk.f32.gmra.mxu0 %vm133_vm0, %v2200_v47 }
  0xe6   :  { %1790 = vmatprep.mubr.msk.f32.mxu0 %vm133_vm0, %v2235_v32 }
  0xe9   :  { %1791 = vmatmul.mubr.msk.f32.gmra.mxu0 %vm133_vm0, %v2232_v21  ;;  %vm1364_vm0 = vcmask 261120  }
 0x144   :  { %v1651_v15 = vpop.f32.mrf.mxu1 }
 0x146   :  { %v2424_v16 = vpop.f32.mrf.mxu1 }
 0x148   :  { %v2426_v27 = vpop.f32.mrf.mxu1 }
 0x14a   :  { %v2428_v28 = vpop.f32.mrf.mxu1 }
 0x14c   :  { %v2430_v33 = vpop.f32.mrf.mxu1 }
 0x14d   :  { %v1611_v34 = vpop.f32.mrf.mxu0 }
 0x14e   :  { %v2432_v40 = vpop.f32.mrf.mxu1  ;;  %v529_v26 = vadd.f32 %v1651_v15, %v1611_v34 }
 0x14f   :  { %v261_v42 = vpop.f32.mrf.mxu0 }
 0x150   :  { %v2434_v48 = vpop.f32.mrf.mxu1 }
 0x151   :  { %v1614_v52 = vpop.f32.mrf.mxu0 }
 0x152   :  { %v2436_v56 = vpop.f32.mrf.mxu1 }
 0x153   :  { %v281_v6 = vpop.f32.mrf.mxu0 }
 0x154   :  { %v2438_v7 = vpop.f32.mrf.mxu1 }
 0x155   :  { %v2440_v12 = vpop.f32.mrf.mxu0 }
 0x156   :  { %v2442_v23 = vpop.f32.mrf.mxu1 }
 0x157   :  { %v2444_v24 = vpop.f32.mrf.mxu0 }
 0x158   :  { %v2446_v35 = vpop.f32.mrf.mxu1 }
 0x159   :  { %v2448_v36 = vpop.f32.mrf.mxu0 }
 0x15a   :  { %v2450_v37 = vpop.f32.mrf.mxu1 }
 0x15b   :  { %v2452_v45 = vpop.f32.mrf.mxu0 }
 0x15c   :  { %v2454_v46 = vpop.f32.mrf.mxu1 }
 0x15d   :  { %v2456_v57 = vpop.f32.mrf.mxu0 }
 0x15e   :  { %v2458_v58 = vpop.f32.mrf.mxu1 }
 0x15f   :  { %2653 = vst [vmem:[#allocation2_spill] sm:$0xff] %v2458_v58  ;;  %v2460_v63 = vpop.f32.mrf.mxu0 }
 0x160   :  { %v2462_v0 = vpop.f32.mrf.mxu1 }
 0x161   :  { %2654 = vst [vmem:[#allocation3_spill] sm:$0xff] %v2462_v0  ;;  %v2464_v17 = vpop.f32.mrf.mxu0 }
 0x162   :  { %v2466_v31 = vpop.f32.mrf.mxu1 }
 0x163   :  { %2655 = vst [vmem:[#allocation4_spill] sm:$0xff] %v2466_v31  ;;  %v2468_v51 = vpop.f32.mrf.mxu0  ;;  %v523_v31 = vadd.f32 %v2424_v16, %v261_v42 }
 0x165   :  { %v1731_v53 = vpop.f32.mrf.mxu1  ;;  %v2470_v62 = vpop.f32.mrf.mxu0 }
 0x167   :  { %v886_v1 = vpop.f32.mrf.mxu1  ;;  %v2472_v38 = vpop.f32.mrf.mxu0 }
 0x169   :  { %v1734_v41 = vpop.f32.mrf.mxu1  ;;  %v2474_v4 = vpop.f32.mrf.mxu0 }
 0x16a   :  { %2656 = vst [vmem:[#allocation5_spill] sm:$0xff] %v2474_v4 }
 0x16b   :  { %v2476_v20 = vpop.f32.mrf.mxu1  ;;  %v2478_v47 = vpop.f32.mrf.mxu0 }
 0x16c   :  { %2657 = vst [vmem:[#allocation6_spill] sm:$0xff] %v2478_v47 }
 0x16d   :  { %v2480_v54 = vpop.f32.mrf.mxu1  ;;  %v1691_v8 = vpop.f32.mrf.mxu0 }
 0x16f   :  { %v2482_v61 = vpop.f32.mrf.mxu1  ;;  %v700_v11 = vpop.f32.mrf.mxu0 }
 0x170   :  { %v701_v0 = vadd.f32 %v700_v11, %v523_v31 }
 0x171   :  { %v2484_v21 = vpop.f32.mrf.mxu1  ;;  %v1694_v32 = vpop.f32.mrf.mxu0 }
 0x173   :  { %v2486_v2 = vpop.f32.mrf.mxu1  ;;  %v714_v5 = vpop.f32.mrf.mxu0 }
 0x175   :  { %v2488_v18 = vpop.f32.mrf.mxu1  ;;  %v1697_v3 = vpop.f32.mrf.mxu0 }
 0x177   :  { %v2490_v19 = vpop.f32.mrf.mxu1  ;;  %v728_v29 = vpop.f32.mrf.mxu0 }
 0x179   :  { %v2492_v55 = vpop.f32.mrf.mxu1  ;;  %v1700_v13 = vpop.f32.mrf.mxu0 }
 0x17a   :  { %2658 = vst [vmem:[#allocation7_spill] sm:$0xff] %v2492_v55  ;;  %v535_v55 = vadd.f32 %v2428_v28, %v281_v6  ;;  %v565_v6 = vadd.f32 %v2434_v48, %v2448_v36 }
 0x17b   :  { %v2494_v39 = vpop.f32.mrf.mxu1  ;;  %v742_v43 = vpop.f32.mrf.mxu0 }
 0x17c   :  { %2659 = vst [vmem:[#allocation8_spill] sm:$0xff] %v2494_v39  ;;  %v715_v16 = vadd.f32 %v714_v5, %v535_v55  ;;  %v577_v5 = vadd.f32 %v2438_v7, %v2456_v57 }
 0x17d   :  { %v2496_v59 = vpop.f32.mrf.mxu1  ;;  %v2498_v60 = vpop.f32.mrf.mxu0 }
 0x17e   :  { %2660 = vst [vmem:[#allocation9_spill] sm:$0xff] %v2496_v59 }
 0x17f   :  { %v2500_v30 = vpop.f32.mrf.mxu1  ;;  %v2502_v44 = vpop.f32.mrf.mxu0 }
 0x180   :  { %2661 = vst [vmem:[#allocation10_spill] sm:$0xff] %v2500_v30  ;;  %v708_v30 = vadd.f32 %v1691_v8, %v529_v26  ;;  %v887_v8 = vadd.f32 %v886_v1, %v701_v0  ;;  %v547_v26 = vadd.f32 %v2432_v40, %v2444_v24  ;;  %v559_v24 = vadd.f32 %v2436_v56, %v2452_v45 }
 0x181   :  { %v2504_v50 = vpop.f32.mrf.mxu1  ;;  %v2506_v49 = vpop.f32.mrf.mxu0  ;;  %v750_v1 = vadd.f32 %v1700_v13, %v565_v6 }
 0x182   :  { %2662 = vst [vmem:[#allocation11_spill] sm:$0xff] %v2504_v50  ;;  %v541_v50 = vadd.f32 %v2426_v27, %v1614_v52 }
 0x183   :  { %v2508_v9 = vpop.f32.mrf.mxu1  ;;  %v2510_v10 = vpop.f32.mrf.mxu0 }
 0x184   :  { %2663 = vst [vmem:[#allocation12_spill] sm:$0xff] %v2508_v9  ;;  %v722_v58 = vadd.f32 %v1694_v32, %v541_v50 }
 0x185   :  { %v1811_v22 = vpop.f32.mrf.mxu1  ;;  %v2512_v25 = vpop.f32.mrf.mxu0 }
 0x186   :  { %2664 = vst [vmem:[#allocation13_spill] sm:$0xff] %v2512_v25  ;;  %v895_v25 = vadd.f32 %v1731_v53, %v708_v30  ;;  %v911_v28 = vadd.f32 %v1734_v41, %v722_v58  ;;  %v729_v30 = vadd.f32 %v728_v29, %v547_v26  ;;  %v743_v29 = vadd.f32 %v742_v43, %v559_v24 }
 0x187   :  { %v1270_v14 = vpop.f32.mrf.mxu1  ;;  %v2514_v59 = vpop.f32.mrf.mxu0  ;;  %v943_v43 = vadd.f32 %v2484_v21, %v750_v1 }
 0x188   :  { %2665 = vst [vmem:[#allocation14_spill] sm:$0xff] %v2514_v59  ;;  %v553_v59 = vadd.f32 %v2430_v33, %v2440_v12  ;;  %v903_v12 = vadd.f32 %v2476_v20, %v715_v16  ;;  %v919_v55 = vadd.f32 %v2482_v61, %v729_v30  ;;  %v2667_v16 = vld [vmem:[#allocation2_spill] sm:$0xff]  ;;  %v2673_v30 = vld [vmem:[#allocation8_spill] sm:$0xff] }
 0x189   :  { %v1814_v47 = vpop.f32.mrf.mxu1  ;;  %v2517_v39 = vpop.f32.mrf.mxu0 }
 0x18a   :  { %v736_v31 = vadd.f32 %v1697_v3, %v553_v59  ;;  %v764_v59 = vadd.f32 %v2498_v60, %v577_v5 }
 0x18b   :  { %v1282_v4 = vpop.f32.mrf.mxu1  ;;  %v2520_v9 = vpop.f32.mrf.mxu0 }
 0x18c   :  { %2666 = vst [vmem:[#allocation15_spill] sm:$0xff] %v2520_v9  ;;  %v927_v41 = vadd.f32 %v2480_v54, %v736_v31  ;;  %v2671_v31 = vld [vmem:[#allocation3_spill] sm:$0xff] }
 0x18d   :  { %v1817_v15 = vpop.f32.mrf.mxu1  ;;  %v1771_v34 = vpop.f32.mrf.mxu0 }
 0x18e   :  { %v1108_v42 = vadd.f32 %v1771_v34, %v895_v25 }
 0x18f   :  { %v1294_v27 = vpop.f32.mrf.mxu1  ;;  %v1101_v52 = vpop.f32.mrf.mxu0  ;;  %v2672_v6 = vld [vmem:[#allocation14_spill] sm:$0xff] }
 0x190   :  { %v1277_v11 = vadd.f32 %v1811_v22, %v1108_v42  ;;  %v1102_v9 = vadd.f32 %v1101_v52, %v887_v8  ;;  %v583_v22 = vadd.f32 %v2450_v37, %v2468_v51  ;;  %v595_v42 = vadd.f32 %v2667_v16, %v2472_v38  ;;  %v2668_v8 = vld [vmem:[#allocation13_spill] sm:$0xff] }
 0x191   :  { %v1820_v53 = vpop.f32.mrf.mxu1  ;;  %v1774_v32 = vpop.f32.mrf.mxu0  ;;  %v2670_v52 = vld [vmem:[#allocation5_spill] sm:$0xff] }
 0x192   :  { %1366 = vst.msk [vmem:[%s2634_s2 + $0x8] sm:$0xff] %vm1364_vm0, %v1277_v11  ;;  %v1271_v33 = vadd.f32 %v1270_v14, %v1102_v9  ;;  %v1120_v40 = vadd.f32 %v1774_v32, %v911_v28  ;;  %v935_v9 = vadd.f32 %v2486_v2, %v743_v29  ;;  %v601_v14 = vadd.f32 %v2454_v46, %v2470_v62 }
 0x193   :  { %v1306_v0 = vpop.f32.mrf.mxu1  ;;  %v1113_v58 = vpop.f32.mrf.mxu0  ;;  %v771_v34 = vadd.f32 %v2510_v10, %v583_v22  ;;  %v2669_v10 = vld [vmem:[#allocation7_spill] sm:$0xff]  ;;  %v613_v11 = vadd.f32 %v2671_v31, %v2670_v52 }
 0x194   :  { %1365 = vst.msk [vmem:[%s2634_s2] sm:$0xff] %vm1364_vm0, %v1271_v33  ;;  %v1289_v48 = vadd.f32 %v1814_v47, %v1120_v40  ;;  %v1114_v36 = vadd.f32 %v1113_v58, %v903_v12  ;;  %v571_v47 = vadd.f32 %v2442_v23, %v2460_v63  ;;  %v792_v26 = vadd.f32 %v2668_v8, %v601_v14  ;;  %v2674_v40 = vld [vmem:[#allocation6_spill] sm:$0xff]  ;;  %v2675_v12 = vld [vmem:[#allocation4_spill] sm:$0xff] }
 0x195   :  { %v1823_v3 = vpop.f32.mrf.mxu1  ;;  %v1777_v20 = vpop.f32.mrf.mxu0  ;;  %v967_v33 = vadd.f32 %v2673_v30, %v771_v34  ;;  %v607_v24 = vadd.f32 %v2675_v12, %v2674_v40  ;;  %v806_v58 = vadd.f32 %v2517_v39, %v613_v11 }
 0x196   :  { %1368 = vst.msk [vmem:[%s2634_s2 + $0x18] sm:$0xff] %vm1364_vm0, %v1289_v48  ;;  %v1283_v56 = vadd.f32 %v1282_v4, %v1114_v36  ;;  %v1132_v45 = vadd.f32 %v1777_v20, %v927_v41  ;;  %v589_v4 = vadd.f32 %v2446_v35, %v2464_v17  ;;  %v757_v23 = vadd.f32 %v2502_v44, %v571_v47  ;;  %v2676_v36 = vld [vmem:[#allocation9_spill] sm:$0xff]  ;;  %v2677_v20 = vld [vmem:[#allocation15_spill] sm:$0xff] }
 0x197   :  { %v1318_v13 = vpop.f32.mrf.mxu1  ;;  %v1125_v54 = vpop.f32.mrf.mxu0  ;;  %v959_v44 = vadd.f32 %v2488_v18, %v764_v59  ;;  %v991_v41 = vadd.f32 %v2676_v36, %v792_v26  ;;  %v799_v29 = vadd.f32 %v2677_v20, %v607_v24  ;;  %v2679_v59 = vld [vmem:[#allocation11_spill] sm:$0xff] }
 0x198   :  { %1367 = vst.msk [vmem:[%s2634_s2 + $0x10] sm:$0xff] %vm1364_vm0, %v1283_v56  ;;  %v1301_v7 = vadd.f32 %v1817_v15, %v1132_v45  ;;  %v1126_v57 = vadd.f32 %v1125_v54, %v919_v55  ;;  %v778_v25 = vadd.f32 %v2506_v49, %v589_v4  ;;  %v951_v49 = vadd.f32 %v2490_v19, %v757_v23  ;;  %v2678_v45 = vld [vmem:[#allocation10_spill] sm:$0xff] }
 0x199   :  { %v1826_v61 = vpop.f32.mrf.mxu1  ;;  %v1780_v50 = vpop.f32.mrf.mxu0 }
 0x19a   :  { %1370 = vst.msk [vmem:[%s2634_s2 + $0x28] sm:$0xff] %vm1364_vm0, %v1301_v7  ;;  %v1295_v63 = vadd.f32 %v1294_v27, %v1126_v57  ;;  %v1144_v60 = vadd.f32 %v1780_v50, %v943_v43  ;;  %v975_v27 = vadd.f32 %v2669_v10, %v778_v25  ;;  %v1007_v7 = vadd.f32 %v2679_v59, %v806_v58  ;;  %v2680_v50 = vld [vmem:[#allocation12_spill] sm:$0xff] }
 0x19b   :  { %v1137_v21 = vpop.f32.mrf.mxu0  ;;  %v1330_v15 = vpop.f32.mrf.mxu1  ;;  %v999_v23 = vadd.f32 %v2680_v50, %v799_v29 }
 0x19c   :  { %1369 = vst.msk [vmem:[%s2634_s2 + $0x20] sm:$0xff] %vm1364_vm0, %v1295_v63  ;;  %v1313_v35 = vadd.f32 %v1820_v53, %v1144_v60  ;;  %v1138_v17 = vadd.f32 %v1137_v21, %v935_v9  ;;  %v785_v53 = vadd.f32 %v2672_v6, %v595_v42 }
 0x19d   :  { %v1783_v2 = vpop.f32.mrf.mxu0  ;;  %v1829_v28 = vpop.f32.mrf.mxu1 }
 0x19e   :  { %1372 = vst.msk [vmem:[%s2634_s2 + $0x38] sm:$0xff] %vm1364_vm0, %v1313_v35  ;;  %v1307_v37 = vadd.f32 %v1306_v0, %v1138_v17  ;;  %v1156_v51 = vadd.f32 %v1783_v2, %v959_v44  ;;  %v983_v55 = vadd.f32 %v2678_v45, %v785_v53 }
 0x19f   :  { %v1149_v18 = vpop.f32.mrf.mxu0  ;;  %v1342_v5 = vpop.f32.mrf.mxu1 }
 0x1a0   :  { %1371 = vst.msk [vmem:[%s2634_s2 + $0x30] sm:$0xff] %vm1364_vm0, %v1307_v37  ;;  %v1325_v46 = vadd.f32 %v1823_v3, %v1156_v51  ;;  %v1150_v62 = vadd.f32 %v1149_v18, %v951_v49 }
 0x1a1   :  { %v1786_v19 = vpop.f32.mrf.mxu0  ;;  %v1832_v57 = vpop.f32.mrf.mxu1 }
 0x1a2   :  { %1374 = vst.msk [vmem:[%s2634_s2 + $0x48] sm:$0xff] %vm1364_vm0, %v1325_v46  ;;  %v1319_v38 = vadd.f32 %v1318_v13, %v1150_v62  ;;  %v1168_v32 = vadd.f32 %v1786_v19, %v975_v27 }
 0x1a3   :  { %v1161_v0 = vpop.f32.mrf.mxu0  ;;  %v1354_v22 = vpop.f32.mrf.mxu1 }
 0x1a4   :  { %1373 = vst.msk [vmem:[%s2634_s2 + $0x40] sm:$0xff] %vm1364_vm0, %v1319_v38  ;;  %v1337_v1 = vadd.f32 %v1826_v61, %v1168_v32  ;;  %v1162_v48 = vadd.f32 %v1161_v0, %v967_v33 }
 0x1a5   :  { %v1789_v3 = vpop.f32.mrf.mxu0 }
 0x1a6   :  { %1376 = vst.msk [vmem:[%s2634_s2 + $0x58] sm:$0xff] %vm1364_vm0, %v1337_v1  ;;  %v1331_v56 = vadd.f32 %v1330_v15, %v1162_v48  ;;  %v1180_v39 = vadd.f32 %v1789_v3, %v991_v41 }
 0x1a7   :  { %v1173_v47 = vpop.f32.mrf.mxu0 }
 0x1a8   :  { %1375 = vst.msk [vmem:[%s2634_s2 + $0x50] sm:$0xff] %vm1364_vm0, %v1331_v56  ;;  %v1349_v13 = vadd.f32 %v1829_v28, %v1180_v39  ;;  %v1174_v54 = vadd.f32 %v1173_v47, %v983_v55 }
 0x1a9   :  { %v1792_v43 = vpop.f32.mrf.mxu0 }
 0x1aa   :  { %1378 = vst.msk [vmem:[%s2634_s2 + $0x68] sm:$0xff] %vm1364_vm0, %v1349_v13  ;;  %v1343_v4 = vadd.f32 %v1342_v5, %v1174_v54  ;;  %v1192_v61 = vadd.f32 %v1792_v43, %v1007_v7 }
 0x1ab   :  { %v1185_v63 = vpop.f32.mrf.mxu0 }
 0x1ac   :  { %1377 = vst.msk [vmem:[%s2634_s2 + $0x60] sm:$0xff] %vm1364_vm0, %v1343_v4  ;;  %v1361_v60 = vadd.f32 %v1832_v57, %v1192_v61  ;;  %v1186_v9 = vadd.f32 %v1185_v63, %v999_v23 }
 0x1ae   :  { %1380 = vst.msk [vmem:[%s2634_s2 + $0x78] sm:$0xff] %vm1364_vm0, %v1361_v60  ;;  %v1355_v21 = vadd.f32 %v1354_v22, %v1186_v9 }
 0x1b0   :  { %1379 = vst.msk [vmem:[%s2634_s2 + $0x70] sm:$0xff] %vm1364_vm0, %v1355_v21 }

// kernel: tpu_custom_call.1
= control target key start
LH: loop header
LB: loop body
LE: loop exit
PB: predicated region body
PF: predicated region fallthrough
CT: control target
= control target key end

     0   :  { %v464_v0 = vmov 0   ;;  %v27_v25 = vlaneseq  ;;  %vm133_vm0 = vcmask 523264   ;;  %v465_v29 = vmov 0.0   ;;  %s651_s0 = inlined_call_operand.vmem [shape: s32[128,1], index: 0, kind: input, shape index: {}]   ;;  %s652_s1 = inlined_call_operand.vmem [shape: f32[64,32], index: 1, kind: input, shape index: {}]   ;;  %s653_s2 = inlined_call_operand.vmem [shape: f32[128,32], index: 2, kind: output, shape index: {}]  }
   0x1   :  { %463 = vset.pattern.permute.xlu1 %v464_v0  ;;  %462 = vset.pattern.permute.xlu0 %v464_v0  ;;  %v12_v1 = vld [vmem:[%s651_s0 + $0x8] sm:$0xff]  ;;  %v11_v2 = vld [vmem:[%s651_s0] sm:$0xff]  ;;  %v132_v5 = vld [vmem:[%s652_s1 + $0x38] sm:$0xff] }
   0x2   :  { %33 = vperm.xlu1 %463, %v12_v1   ;;  %30 = vperm.xlu0 %462, %v11_v2   ;;  %v20_v3 = vld [vmem:[%s651_s0 + $0x48] sm:$0xff]  ;;  %v19_v4 = vld [vmem:[%s651_s0 + $0x40] sm:$0xff]  ;;  %v131_v6 = vld [vmem:[%s652_s1 + $0x30] sm:$0xff]  ;;  %v553_v26 = vand.u32 127, %v27_v25 }
   0x3   :  { %v21_v7 = vld [vmem:[%s651_s0 + $0x50] sm:$0xff]  ;;  %404 = vmatprep.subr.mxu0 %v132_v5  ;;  %444 = vmatprep.subr.mxu1 %v132_v5  ;;  %v130_v9 = vld [vmem:[%s652_s1 + $0x28] sm:$0xff]  ;;  %v22_v10 = vld [vmem:[%s651_s0 + $0x58] sm:$0xff] }
   0x4   :  { %v13_v8 = vld [vmem:[%s651_s0 + $0x10] sm:$0xff]  ;;  %405 = vmatpush3.msra.mxu0 %v132_v5  ;;  %452 = vmatpush3.msra.mxu1 %v132_v5  ;;  %v14_v11 = vld [vmem:[%s651_s0 + $0x18] sm:$0xff]  ;;  %v129_v12 = vld [vmem:[%s652_s1 + $0x20] sm:$0xff] }
   0x5   :  { %406 = vmatprep.subr.mxu0 %v131_v6  ;;  %445 = vmatprep.subr.mxu1 %v131_v6  ;;  %v128_v13 = vld [vmem:[%s652_s1 + $0x18] sm:$0xff]  ;;  %v23_v14 = vld [vmem:[%s651_s0 + $0x60] sm:$0xff]  ;;  %v127_v16 = vld [vmem:[%s652_s1 + $0x10] sm:$0xff] }
   0x6   :  { %57 = vperm.xlu1 %463, %v20_v3   ;;  %54 = vperm.xlu0 %462, %v19_v4   ;;  %v15_v15 = vld [vmem:[%s651_s0 + $0x20] sm:$0xff]  ;;  %v24_v17 = vld [vmem:[%s651_s0 + $0x68] sm:$0xff]  ;;  %v25_v21 = vld [vmem:[%s651_s0 + $0x70] sm:$0xff] }
   0x7   :  { %407 = vmatpush3.msra.mxu0 %v131_v6  ;;  %453 = vmatpush3.msra.mxu1 %v131_v6  ;;  %v16_v18 = vld [vmem:[%s651_s0 + $0x28] sm:$0xff]  ;;  %v125_v20 = vld [vmem:[%s652_s1] sm:$0xff]  ;;  %v17_v22 = vld [vmem:[%s651_s0 + $0x30] sm:$0xff] }
   0x8   :  { %408 = vmatprep.subr.mxu0 %v130_v9  ;;  %446 = vmatprep.subr.mxu1 %v130_v9  ;;  %v126_v19 = vld [vmem:[%s652_s1 + $0x8] sm:$0xff]  ;;  %v26_v23 = vld [vmem:[%s651_s0 + $0x78] sm:$0xff] }
   0x9   :  { %409 = vmatpush3.msra.mxu0 %v130_v9  ;;  %454 = vmatpush3.msra.mxu1 %v130_v9  ;;  %v18_v24 = vld [vmem:[%s651_s0 + $0x38] sm:$0xff] }
   0xa   :  { %60 = vperm.xlu1 %463, %v21_v7   ;;  %36 = vperm.xlu0 %462, %v13_v8  }
   0xb   :  { %410 = vmatprep.subr.mxu0 %v129_v12  ;;  %447 = vmatprep.subr.mxu1 %v129_v12 }
   0xc   :  { %411 = vmatpush3.msra.mxu0 %v129_v12  ;;  %455 = vmatpush3.msra.mxu1 %v129_v12 }
   0xd   :  { %412 = vmatprep.subr.mxu0 %v128_v13  ;;  %448 = vmatprep.subr.mxu1 %v128_v13 }
   0xe   :  { %63 = vperm.xlu1 %463, %v22_v10   ;;  %39 = vperm.xlu0 %462, %v14_v11  }
   0xf   :  { %413 = vmatpush3.msra.mxu0 %v128_v13  ;;  %456 = vmatpush3.msra.mxu1 %v128_v13 }
  0x10   :  { %414 = vmatprep.subr.mxu0 %v127_v16  ;;  %449 = vmatprep.subr.mxu1 %v127_v16 }
  0x11   :  { %415 = vmatpush3.msra.mxu0 %v127_v16  ;;  %457 = vmatpush3.msra.mxu1 %v127_v16 }
  0x12   :  { %66 = vperm.xlu1 %463, %v23_v14   ;;  %42 = vperm.xlu0 %462, %v15_v15  }
  0x13   :  { %416 = vmatprep.subr.mxu0 %v126_v19  ;;  %450 = vmatprep.subr.mxu1 %v126_v19 }
  0x14   :  { %417 = vmatpush3.msra.mxu0 %v126_v19  ;;  %458 = vmatpush3.msra.mxu1 %v126_v19 }
  0x15   :  { %418 = vmatprep.subr.mxu0 %v125_v20  ;;  %451 = vmatprep.subr.mxu1 %v125_v20 }
  0x16   :  { %69 = vperm.xlu1 %463, %v24_v17   ;;  %45 = vperm.xlu0 %462, %v16_v18  }
  0x17   :  { %419 = vmatpush3.msra.mxu0 %v125_v20  ;;  %459 = vmatpush3.msra.mxu1 %v125_v20 }
  0x1a   :  { %72 = vperm.xlu1 %463, %v25_v21   ;;  %48 = vperm.xlu0 %462, %v17_v22  }
  0x1e   :  { %75 = vperm.xlu1 %463, %v26_v23   ;;  %51 = vperm.xlu0 %462, %v18_v24  }
  0x7d   :  { %v34_v27 = vpop.permute.xlu1 %33  ;;  %v31_v28 = vpop.permute.xlu0 %30 }
  0x7e   :  { %vm78_vm1 = vcmp.eq.s32.totalorder %v34_v27, %v553_v26  ;;  %vm77_vm2 = vcmp.eq.s32.totalorder %v31_v28, %v553_v26 }
  0x7f   :  { %v349_v30 = vsel %vm78_vm1, 1.0, %v465_v29  ;;  %v348_v31 = vsel %vm77_vm2, 1.0, %v465_v29  ;;  %vm327_vm2 = vcmask 261120  }
  0x80   :  { %420 = vmatprep.mubr.msk.f32.mxu0 %vm133_vm0, %v348_v31 }
  0x81   :  { %v58_v32 = vpop.permute.xlu1 %57  ;;  %421 = vmatmul.mubr.msk.f32.vlgmr.msra.gmra.mxu0 %vm133_vm0, %v349_v30  ;;  %v55_v33 = vpop.permute.xlu0 %54 }
  0x82   :  { %vm86_vm3 = vcmp.eq.s32.totalorder %v58_v32, %v553_v26  ;;  %vm85_vm4 = vcmp.eq.s32.totalorder %v55_v33, %v553_v26 }
  0x83   :  { %v357_v34 = vsel %vm86_vm3, 1.0, %v465_v29  ;;  %v356_v35 = vsel %vm85_vm4, 1.0, %v465_v29 }
  0x84   :  { %432 = vmatprep.mubr.msk.f32.mxu1 %vm133_vm0, %v356_v35 }
  0x85   :  { %v61_v36 = vpop.permute.xlu1 %60  ;;  %433 = vmatmul.mubr.msk.f32.vlgmr.msra.gmra.mxu1 %vm133_vm0, %v357_v34  ;;  %v37_v37 = vpop.permute.xlu0 %36 }
  0x86   :  { %vm87_vm5 = vcmp.eq.s32.totalorder %v61_v36, %v553_v26  ;;  %vm79_vm6 = vcmp.eq.s32.totalorder %v37_v37, %v553_v26 }
  0x87   :  { %v358_v38 = vsel %vm87_vm5, 1.0, %v465_v29  ;;  %v350_v39 = vsel %vm79_vm6, 1.0, %v465_v29 }
  0x88   :  { %423 = vmatprep.mubr.msk.f32.mxu0 %vm133_vm0, %v350_v39  ;;  %435 = vmatprep.mubr.msk.f32.mxu1 %vm133_vm0, %v358_v38 }
  0x89   :  { %v64_v40 = vpop.permute.xlu1 %63  ;;  %v40_v41 = vpop.permute.xlu0 %39 }
  0x8a   :  { %vm88_vm7 = vcmp.eq.s32.totalorder %v64_v40, %v553_v26  ;;  %vm80_vm8 = vcmp.eq.s32.totalorder %v40_v41, %v553_v26 }
  0x8b   :  { %v359_v42 = vsel %vm88_vm7, 1.0, %v465_v29  ;;  %v351_v43 = vsel %vm80_vm8, 1.0, %v465_v29 }
  0x8c   :  { %424 = vmatmul.mubr.msk.f32.gmra.mxu0 %vm133_vm0, %v351_v43  ;;  %436 = vmatmul.mubr.msk.f32.gmra.mxu1 %vm133_vm0, %v359_v42 }
  0x8d   :  { %v67_v44 = vpop.permute.xlu1 %66  ;;  %v43_v45 = vpop.permute.xlu0 %42 }
  0x8e   :  { %vm89_vm9 = vcmp.eq.s32.totalorder %v67_v44, %v553_v26  ;;  %vm81_vm10 = vcmp.eq.s32.totalorder %v43_v45, %v553_v26 }
  0x8f   :  { %v360_v46 = vsel %vm89_vm9, 1.0, %v465_v29  ;;  %v352_v47 = vsel %vm81_vm10, 1.0, %v465_v29 }
  0x90   :  { %426 = vmatprep.mubr.msk.f32.mxu0 %vm133_vm0, %v352_v47  ;;  %438 = vmatprep.mubr.msk.f32.mxu1 %vm133_vm0, %v360_v46 }
  0x91   :  { %v70_v48 = vpop.permute.xlu1 %69  ;;  %v46_v49 = vpop.permute.xlu0 %45 }
  0x92   :  { %vm90_vm11 = vcmp.eq.s32.totalorder %v70_v48, %v553_v26  ;;  %vm82_vm12 = vcmp.eq.s32.totalorder %v46_v49, %v553_v26 }
  0x93   :  { %v361_v50 = vsel %vm90_vm11, 1.0, %v465_v29  ;;  %v353_v51 = vsel %vm82_vm12, 1.0, %v465_v29 }
  0x94   :  { %427 = vmatmul.mubr.msk.f32.gmra.mxu0 %vm133_vm0, %v353_v51  ;;  %439 = vmatmul.mubr.msk.f32.gmra.mxu1 %vm133_vm0, %v361_v50 }
  0x95   :  { %v73_v52 = vpop.permute.xlu1 %72  ;;  %v49_v53 = vpop.permute.xlu0 %48 }
  0x96   :  { %vm91_vm13 = vcmp.eq.s32.totalorder %v73_v52, %v553_v26  ;;  %vm83_vm14 = vcmp.eq.s32.totalorder %v49_v53, %v553_v26 }
  0x97   :  { %v362_v54 = vsel %vm91_vm13, 1.0, %v465_v29  ;;  %v354_v55 = vsel %vm83_vm14, 1.0, %v465_v29 }
  0x98   :  { %429 = vmatprep.mubr.msk.f32.mxu0 %vm133_vm0, %v354_v55  ;;  %441 = vmatprep.mubr.msk.f32.mxu1 %vm133_vm0, %v362_v54 }
  0x99   :  { %v76_v56 = vpop.permute.xlu1 %75  ;;  %v52_v57 = vpop.permute.xlu0 %51 }
  0x9a   :  { %vm92_vm15 = vcmp.eq.s32.totalorder %v76_v56, %v553_v26  ;;  %vm84_vm1 = vcmp.eq.s32.totalorder %v52_v57, %v553_v26 }
  0x9b   :  { %v363_v58 = vsel %vm92_vm15, 1.0, %v465_v29  ;;  %v355_v59 = vsel %vm84_vm1, 1.0, %v465_v29 }
  0x9c   :  { %430 = vmatmul.mubr.msk.f32.gmra.mxu0 %vm133_vm0, %v355_v59  ;;  %442 = vmatmul.mubr.msk.f32.gmra.mxu1 %vm133_vm0, %v363_v58 }
 0x141   :  { %v422_v60 = vpop.f32.mrf.mxu0 }
 0x142   :  { %329 = vst.msk [vmem:[%s653_s2 + $0x8] sm:$0xff] %vm327_vm2, %v422_v60 }
 0x143   :  { %v248_v61 = vpop.f32.mrf.mxu0 }
 0x144   :  { %328 = vst.msk [vmem:[%s653_s2] sm:$0xff] %vm327_vm2, %v248_v61 }
 0x145   :  { %v434_v62 = vpop.f32.mrf.mxu1 }
 0x146   :  { %337 = vst.msk [vmem:[%s653_s2 + $0x48] sm:$0xff] %vm327_vm2, %v434_v62 }
 0x147   :  { %v288_v63 = vpop.f32.mrf.mxu1 }
 0x148   :  { %336 = vst.msk [vmem:[%s653_s2 + $0x40] sm:$0xff] %vm327_vm2, %v288_v63 }
 0x14c   :  { %v425_v0 = vpop.f32.mrf.mxu0  ;;  %v437_v1 = vpop.f32.mrf.mxu1 }
 0x14d   :  { %331 = vst.msk [vmem:[%s653_s2 + $0x18] sm:$0xff] %vm327_vm2, %v425_v0  ;;  %339 = vst.msk [vmem:[%s653_s2 + $0x58] sm:$0xff] %vm327_vm2, %v437_v1 }
 0x14e   :  { %v258_v2 = vpop.f32.mrf.mxu0  ;;  %v298_v3 = vpop.f32.mrf.mxu1 }
 0x14f   :  { %330 = vst.msk [vmem:[%s653_s2 + $0x10] sm:$0xff] %vm327_vm2, %v258_v2  ;;  %338 = vst.msk [vmem:[%s653_s2 + $0x50] sm:$0xff] %vm327_vm2, %v298_v3 }
 0x154   :  { %v428_v4 = vpop.f32.mrf.mxu0  ;;  %v440_v5 = vpop.f32.mrf.mxu1 }
 0x155   :  { %333 = vst.msk [vmem:[%s653_s2 + $0x28] sm:$0xff] %vm327_vm2, %v428_v4  ;;  %341 = vst.msk [vmem:[%s653_s2 + $0x68] sm:$0xff] %vm327_vm2, %v440_v5 }
 0x156   :  { %v268_v6 = vpop.f32.mrf.mxu0  ;;  %v308_v7 = vpop.f32.mrf.mxu1 }
 0x157   :  { %332 = vst.msk [vmem:[%s653_s2 + $0x20] sm:$0xff] %vm327_vm2, %v268_v6  ;;  %340 = vst.msk [vmem:[%s653_s2 + $0x60] sm:$0xff] %vm327_vm2, %v308_v7 }
 0x15c   :  { %v431_v8 = vpop.f32.mrf.mxu0  ;;  %v443_v9 = vpop.f32.mrf.mxu1 }
 0x15d   :  { %335 = vst.msk [vmem:[%s653_s2 + $0x38] sm:$0xff] %vm327_vm2, %v431_v8  ;;  %343 = vst.msk [vmem:[%s653_s2 + $0x78] sm:$0xff] %vm327_vm2, %v443_v9 }
 0x15e   :  { %v278_v10 = vpop.f32.mrf.mxu0  ;;  %v318_v11 = vpop.f32.mrf.mxu1 }
 0x15f   :  { %334 = vst.msk [vmem:[%s653_s2 + $0x30] sm:$0xff] %vm327_vm2, %v278_v10  ;;  %342 = vst.msk [vmem:[%s653_s2 + $0x70] sm:$0xff] %vm327_vm2, %v318_v11 }

</bundles_post_ra>
